<compile_context>
chip_gen: v7x
topology: tpu7x:2x2x1
jax: 0.10.0
libtpu: 0.0.40
codegen_flags: <defaults>
</compile_context>

<pallas_src>
import jax
import jax.numpy as jnp
from jax.experimental import pallas as pl
from jax.experimental.pallas import tpu as pltpu

HIDDEN = 10
LANES = 128


def simple_nn_kernel(x_ref, u_ref, v_ref, w2_ref, ab_ref, o_ref):
    # x_ref: (block_rows, 128) f32 VMEM tile, batch packed lane-dense.
    # u_ref = 0.5*w1, v_ref = 0.5*b1, w2_ref = fc2 weights      (10,) f32 SMEM
    # ab_ref = [A, B] with A = 0.5*sum(w2*w1), B = 0.5*sum(w2*b1) + b2  (2,) SMEM
    x = x_ref[...]

    # Hoist all SMEM scalar reads once (scalar path; broadcast is free).
    u = [u_ref[j] for j in range(HIDDEN)]
    v = [v_ref[j] for j in range(HIDDEN)]
    w2 = [w2_ref[j] for j in range(HIDDEN)]
    A = ab_ref[0]
    B = ab_ref[1]

    # Folded linear part of SiLU + fc2:  out = sum_j w2_j*t_j*tanh(t_j) + A*x + B
    acc = A * x + B
    for j in range(HIDDEN):                 # unrolled: pure VPU + one EUP tanh each
        t = u[j] * x + v[j]                 # t = 0.5 * (w1_j * x + b1_j)
        acc = acc + w2[j] * (t * jnp.tanh(t))
    o_ref[...] = acc.astype(o_ref.dtype)


def _round_up(a, b):
    return -(-a // b) * b


def simple_nn_forward(x, w1, b1, w2, b2, *, tile_rows=2048):
    """x: (N, 1) f32 -> (N, 1) f32.

    Weight layout vs PyTorch: w1 = fc1.weight.reshape(10), b1 = fc1.bias,
    w2 = fc2.weight.reshape(10), b2 = fc2.bias (shape (1,)).
    """
    N = x.shape[0]
    rows = -(-N // LANES)                                   # ceil(N / 128)

    # Tile sizing: clamp so 2x(in)+2x(out) double-buffered tiles stay well
    # under the scoped-VMEM default on every generation (<= 8 MiB total).
    tile_rows = max(8, min(int(tile_rows), 4096))
    tile_rows = _round_up(tile_rows, 8)

    steps = max(1, -(-rows // tile_rows))
    if rows >= 16:
        steps = max(steps, 2)                # v7x: give both TensorCores work
    if steps == 1:
        block_rows = rows                    # full-extent block (exempt from 8-row rule)
    else:
        block_rows = max(8, _round_up(-(-rows // steps), 8))
    rows_padded = _round_up(rows, block_rows)

    # Fold fc1/fc2 constants on the host side (tiny, O(HIDDEN) work).
    u = (0.5 * w1).astype(jnp.float32)
    v = (0.5 * b1).astype(jnp.float32)
    w2f = w2.astype(jnp.float32)
    A = 0.5 * jnp.sum(w2 * w1)
    B = 0.5 * jnp.sum(w2 * b1) + b2[0]
    ab = jnp.stack([A, B]).astype(jnp.float32)

    # Lane-dense packing.  Fast path (no pad / no slice) when N fills the grid.
    pad = rows_padded * LANES - N
    x_flat = x.reshape(-1)
    if pad:
        x_flat = jnp.pad(x_flat, (0, pad))
    x2d = x_flat.reshape(rows_padded, LANES)

    out2d = pl.pallas_call(
        simple_nn_kernel,
        out_shape=jax.ShapeDtypeStruct((rows_padded, LANES), x.dtype),
        grid=(rows_padded // block_rows,),
        in_specs=[
            pl.BlockSpec((block_rows, LANES), lambda i: (i, 0)),        # x tile
            pl.BlockSpec(memory_space=pltpu.MemorySpace.SMEM),          # u = 0.5*w1
            pl.BlockSpec(memory_space=pltpu.MemorySpace.SMEM),          # v = 0.5*b1
            pl.BlockSpec(memory_space=pltpu.MemorySpace.SMEM),          # w2
            pl.BlockSpec(memory_space=pltpu.MemorySpace.SMEM),          # [A, B]
        ],
        out_specs=pl.BlockSpec((block_rows, LANES), lambda i: (i, 0)),
        compiler_params=pltpu.CompilerParams(
            dimension_semantics=("parallel",),   # batch axis: megacore-shardable
        ),
    )(x2d, u, v, w2f, ab)

    out_flat = out2d.reshape(-1)
    if pad:
        out_flat = out_flat[:N]
    return out_flat.reshape(N, 1)


def init_params(key):
    """Mimic PyTorch nn.Linear default init U(-1/sqrt(fan_in), +1/sqrt(fan_in))."""
    k1, k2, k3, k4 = jax.random.split(key, 4)
    bound1 = 1.0                        # fc1: fan_in = 1
    w1 = jax.random.uniform(k1, (HIDDEN,), jnp.float32, -bound1, bound1)
    b1 = jax.random.uniform(k2, (HIDDEN,), jnp.float32, -bound1, bound1)
    bound2 = 1.0 / (10.0 ** 0.5)        # fc2: fan_in = 10
    w2 = jax.random.uniform(k3, (HIDDEN,), jnp.float32, -bound2, bound2)
    b2 = jax.random.uniform(k4, (1,), jnp.float32, -bound2, bound2)
    return w1, b1, w2, b2


def reference_forward(x, w1, b1, w2, b2):
    h = x * w1[None, :] + b1[None, :]          # (N, 10)  fc1
    h = h * jax.nn.sigmoid(h)                  # SiLU
    return h @ w2[:, None] + b2                # (N, 1)   fc2


if __name__ == "__main__":
    key = jax.random.PRNGKey(0)
    pkey, xkey = jax.random.split(key)
    w1, b1, w2, b2 = init_params(pkey)

    # Small batches of scalar inputs (x values for fitting sin(x)).
    # N=256 exercises the pad-free fast path; N=200 exercises the ragged tail.
    for N in (256, 200):
        x = jax.random.uniform(jax.random.fold_in(xkey, N), (N, 1),
                               jnp.float32, -3.14159, 3.14159)
        out = simple_nn_forward(x, w1, b1, w2, b2)
        out = jax.block_until_ready(out)
        ref = reference_forward(x, w1, b1, w2, b2)
        assert out.shape == (N, 1)
        err = float(jnp.max(jnp.abs(out - ref)))
        # Exact tanh-based sigmoid -> tight parity with the PyTorch reference.
        assert err < 1e-4, f"N={N}: max abs err={err}"

    print("KERNEL_OK")
</pallas_src>

<mosaic_0001>
module attributes {stable_mosaic.version = 11 : i64} {
  func.func @simple_nn_kernel(%arg0: i32, %arg1: memref<2x128xf32, #tpu.memory_space<vmem>>, %arg2: memref<10xf32, #tpu.memory_space<smem>>, %arg3: memref<10xf32, #tpu.memory_space<smem>>, %arg4: memref<10xf32, #tpu.memory_space<smem>>, %arg5: memref<2xf32, #tpu.memory_space<smem>>, %arg6: memref<2x128xf32, #tpu.memory_space<vmem>>) attributes {dimension_semantics = [#tpu.dimension_semantics<parallel>], iteration_bounds = array<i64: 1>, scalar_prefetch = 0 : i64, scratch_operands = 0 : i64, tpu.core_type = #tpu.core_type<tc>, window_params = [{transform_indices = @transform_0, window_bounds = array<i64: 2, 128>}, {transform_indices = @transform_1, window_bounds = array<i64: 10>}, {transform_indices = @transform_2, window_bounds = array<i64: 10>}, {transform_indices = @transform_3, window_bounds = array<i64: 10>}, {transform_indices = @transform_4, window_bounds = array<i64: 2>}, {transform_indices = @transform_5, window_bounds = array<i64: 2, 128>}]} {
    %c0 = arith.constant 0 : index
    %c0_0 = arith.constant 0 : index
    %0 = vector.load %arg1[%c0, %c0_0] : memref<2x128xf32, #tpu.memory_space<vmem>>, vector<2x128xf32>
    %c0_1 = arith.constant 0 : index
    %1 = memref.load %arg2[%c0_1] : memref<10xf32, #tpu.memory_space<smem>>
    %c1 = arith.constant 1 : index
    %2 = memref.load %arg2[%c1] : memref<10xf32, #tpu.memory_space<smem>>
    %c2 = arith.constant 2 : index
    %3 = memref.load %arg2[%c2] : memref<10xf32, #tpu.memory_space<smem>>
    %c3 = arith.constant 3 : index
    %4 = memref.load %arg2[%c3] : memref<10xf32, #tpu.memory_space<smem>>
    %c4 = arith.constant 4 : index
    %5 = memref.load %arg2[%c4] : memref<10xf32, #tpu.memory_space<smem>>
    %c5 = arith.constant 5 : index
    %6 = memref.load %arg2[%c5] : memref<10xf32, #tpu.memory_space<smem>>
    %c6 = arith.constant 6 : index
    %7 = memref.load %arg2[%c6] : memref<10xf32, #tpu.memory_space<smem>>
    %c7 = arith.constant 7 : index
    %8 = memref.load %arg2[%c7] : memref<10xf32, #tpu.memory_space<smem>>
    %c8 = arith.constant 8 : index
    %9 = memref.load %arg2[%c8] : memref<10xf32, #tpu.memory_space<smem>>
    %c9 = arith.constant 9 : index
    %10 = memref.load %arg2[%c9] : memref<10xf32, #tpu.memory_space<smem>>
    %c0_2 = arith.constant 0 : index
    %11 = memref.load %arg3[%c0_2] : memref<10xf32, #tpu.memory_space<smem>>
    %c1_3 = arith.constant 1 : index
    %12 = memref.load %arg3[%c1_3] : memref<10xf32, #tpu.memory_space<smem>>
    %c2_4 = arith.constant 2 : index
    %13 = memref.load %arg3[%c2_4] : memref<10xf32, #tpu.memory_space<smem>>
    %c3_5 = arith.constant 3 : index
    %14 = memref.load %arg3[%c3_5] : memref<10xf32, #tpu.memory_space<smem>>
    %c4_6 = arith.constant 4 : index
    %15 = memref.load %arg3[%c4_6] : memref<10xf32, #tpu.memory_space<smem>>
    %c5_7 = arith.constant 5 : index
    %16 = memref.load %arg3[%c5_7] : memref<10xf32, #tpu.memory_space<smem>>
    %c6_8 = arith.constant 6 : index
    %17 = memref.load %arg3[%c6_8] : memref<10xf32, #tpu.memory_space<smem>>
    %c7_9 = arith.constant 7 : index
    %18 = memref.load %arg3[%c7_9] : memref<10xf32, #tpu.memory_space<smem>>
    %c8_10 = arith.constant 8 : index
    %19 = memref.load %arg3[%c8_10] : memref<10xf32, #tpu.memory_space<smem>>
    %c9_11 = arith.constant 9 : index
    %20 = memref.load %arg3[%c9_11] : memref<10xf32, #tpu.memory_space<smem>>
    %c0_12 = arith.constant 0 : index
    %21 = memref.load %arg4[%c0_12] : memref<10xf32, #tpu.memory_space<smem>>
    %c1_13 = arith.constant 1 : index
    %22 = memref.load %arg4[%c1_13] : memref<10xf32, #tpu.memory_space<smem>>
    %c2_14 = arith.constant 2 : index
    %23 = memref.load %arg4[%c2_14] : memref<10xf32, #tpu.memory_space<smem>>
    %c3_15 = arith.constant 3 : index
    %24 = memref.load %arg4[%c3_15] : memref<10xf32, #tpu.memory_space<smem>>
    %c4_16 = arith.constant 4 : index
    %25 = memref.load %arg4[%c4_16] : memref<10xf32, #tpu.memory_space<smem>>
    %c5_17 = arith.constant 5 : index
    %26 = memref.load %arg4[%c5_17] : memref<10xf32, #tpu.memory_space<smem>>
    %c6_18 = arith.constant 6 : index
    %27 = memref.load %arg4[%c6_18] : memref<10xf32, #tpu.memory_space<smem>>
    %c7_19 = arith.constant 7 : index
    %28 = memref.load %arg4[%c7_19] : memref<10xf32, #tpu.memory_space<smem>>
    %c8_20 = arith.constant 8 : index
    %29 = memref.load %arg4[%c8_20] : memref<10xf32, #tpu.memory_space<smem>>
    %c9_21 = arith.constant 9 : index
    %30 = memref.load %arg4[%c9_21] : memref<10xf32, #tpu.memory_space<smem>>
    %c0_22 = arith.constant 0 : index
    %31 = memref.load %arg5[%c0_22] : memref<2xf32, #tpu.memory_space<smem>>
    %c1_23 = arith.constant 1 : index
    %32 = memref.load %arg5[%c1_23] : memref<2xf32, #tpu.memory_space<smem>>
    %33 = vector.broadcast %31 : f32 to vector<2x128xf32>
    %34 = arith.mulf %33, %0 : vector<2x128xf32>
    %35 = vector.broadcast %32 : f32 to vector<2x128xf32>
    %36 = arith.addf %34, %35 : vector<2x128xf32>
    %37 = vector.broadcast %1 : f32 to vector<2x128xf32>
    %38 = arith.mulf %37, %0 : vector<2x128xf32>
    %39 = vector.broadcast %11 : f32 to vector<2x128xf32>
    %40 = arith.addf %38, %39 : vector<2x128xf32>
    %41 = math.tanh %40 : vector<2x128xf32>
    %42 = arith.mulf %40, %41 : vector<2x128xf32>
    %43 = vector.broadcast %21 : f32 to vector<2x128xf32>
    %44 = arith.mulf %43, %42 : vector<2x128xf32>
    %45 = arith.addf %36, %44 : vector<2x128xf32>
    %46 = vector.broadcast %2 : f32 to vector<2x128xf32>
    %47 = arith.mulf %46, %0 : vector<2x128xf32>
    %48 = vector.broadcast %12 : f32 to vector<2x128xf32>
    %49 = arith.addf %47, %48 : vector<2x128xf32>
    %50 = math.tanh %49 : vector<2x128xf32>
    %51 = arith.mulf %49, %50 : vector<2x128xf32>
    %52 = vector.broadcast %22 : f32 to vector<2x128xf32>
    %53 = arith.mulf %52, %51 : vector<2x128xf32>
    %54 = arith.addf %45, %53 : vector<2x128xf32>
    %55 = vector.broadcast %3 : f32 to vector<2x128xf32>
    %56 = arith.mulf %55, %0 : vector<2x128xf32>
    %57 = vector.broadcast %13 : f32 to vector<2x128xf32>
    %58 = arith.addf %56, %57 : vector<2x128xf32>
    %59 = math.tanh %58 : vector<2x128xf32>
    %60 = arith.mulf %58, %59 : vector<2x128xf32>
    %61 = vector.broadcast %23 : f32 to vector<2x128xf32>
    %62 = arith.mulf %61, %60 : vector<2x128xf32>
    %63 = arith.addf %54, %62 : vector<2x128xf32>
    %64 = vector.broadcast %4 : f32 to vector<2x128xf32>
    %65 = arith.mulf %64, %0 : vector<2x128xf32>
    %66 = vector.broadcast %14 : f32 to vector<2x128xf32>
    %67 = arith.addf %65, %66 : vector<2x128xf32>
    %68 = math.tanh %67 : vector<2x128xf32>
    %69 = arith.mulf %67, %68 : vector<2x128xf32>
    %70 = vector.broadcast %24 : f32 to vector<2x128xf32>
    %71 = arith.mulf %70, %69 : vector<2x128xf32>
    %72 = arith.addf %63, %71 : vector<2x128xf32>
    %73 = vector.broadcast %5 : f32 to vector<2x128xf32>
    %74 = arith.mulf %73, %0 : vector<2x128xf32>
    %75 = vector.broadcast %15 : f32 to vector<2x128xf32>
    %76 = arith.addf %74, %75 : vector<2x128xf32>
    %77 = math.tanh %76 : vector<2x128xf32>
    %78 = arith.mulf %76, %77 : vector<2x128xf32>
    %79 = vector.broadcast %25 : f32 to vector<2x128xf32>
    %80 = arith.mulf %79, %78 : vector<2x128xf32>
    %81 = arith.addf %72, %80 : vector<2x128xf32>
    %82 = vector.broadcast %6 : f32 to vector<2x128xf32>
    %83 = arith.mulf %82, %0 : vector<2x128xf32>
    %84 = vector.broadcast %16 : f32 to vector<2x128xf32>
    %85 = arith.addf %83, %84 : vector<2x128xf32>
    %86 = math.tanh %85 : vector<2x128xf32>
    %87 = arith.mulf %85, %86 : vector<2x128xf32>
    %88 = vector.broadcast %26 : f32 to vector<2x128xf32>
    %89 = arith.mulf %88, %87 : vector<2x128xf32>
    %90 = arith.addf %81, %89 : vector<2x128xf32>
    %91 = vector.broadcast %7 : f32 to vector<2x128xf32>
    %92 = arith.mulf %91, %0 : vector<2x128xf32>
    %93 = vector.broadcast %17 : f32 to vector<2x128xf32>
    %94 = arith.addf %92, %93 : vector<2x128xf32>
    %95 = math.tanh %94 : vector<2x128xf32>
    %96 = arith.mulf %94, %95 : vector<2x128xf32>
    %97 = vector.broadcast %27 : f32 to vector<2x128xf32>
    %98 = arith.mulf %97, %96 : vector<2x128xf32>
    %99 = arith.addf %90, %98 : vector<2x128xf32>
    %100 = vector.broadcast %8 : f32 to vector<2x128xf32>
    %101 = arith.mulf %100, %0 : vector<2x128xf32>
    %102 = vector.broadcast %18 : f32 to vector<2x128xf32>
    %103 = arith.addf %101, %102 : vector<2x128xf32>
    %104 = math.tanh %103 : vector<2x128xf32>
    %105 = arith.mulf %103, %104 : vector<2x128xf32>
    %106 = vector.broadcast %28 : f32 to vector<2x128xf32>
    %107 = arith.mulf %106, %105 : vector<2x128xf32>
    %108 = arith.addf %99, %107 : vector<2x128xf32>
    %109 = vector.broadcast %9 : f32 to vector<2x128xf32>
    %110 = arith.mulf %109, %0 : vector<2x128xf32>
    %111 = vector.broadcast %19 : f32 to vector<2x128xf32>
    %112 = arith.addf %110, %111 : vector<2x128xf32>
    %113 = math.tanh %112 : vector<2x128xf32>
    %114 = arith.mulf %112, %113 : vector<2x128xf32>
    %115 = vector.broadcast %29 : f32 to vector<2x128xf32>
    %116 = arith.mulf %115, %114 : vector<2x128xf32>
    %117 = arith.addf %108, %116 : vector<2x128xf32>
    %118 = vector.broadcast %10 : f32 to vector<2x128xf32>
    %119 = arith.mulf %118, %0 : vector<2x128xf32>
    %120 = vector.broadcast %20 : f32 to vector<2x128xf32>
    %121 = arith.addf %119, %120 : vector<2x128xf32>
    %122 = math.tanh %121 : vector<2x128xf32>
    %123 = arith.mulf %121, %122 : vector<2x128xf32>
    %124 = vector.broadcast %30 : f32 to vector<2x128xf32>
    %125 = arith.mulf %124, %123 : vector<2x128xf32>
    %126 = arith.addf %117, %125 : vector<2x128xf32>
    %c0_24 = arith.constant 0 : index
    %c0_25 = arith.constant 0 : index
    %127 = vector.load %arg6[%c0_24, %c0_25] : memref<2x128xf32, #tpu.memory_space<vmem>>, vector<2x128xf32>
    tpu.vector_store %arg6[%c0_24, %c0_25], %126 {strides = array<i32>} : memref<2x128xf32, #tpu.memory_space<vmem>>, vector<2x128xf32>,
    return
  }
  func.func @transform_0(%arg0: i32) -> (i32, i32) {
    %c0_i32 = arith.constant 0 : i32
    %c0_i32_0 = arith.constant 0 : i32
    return %arg0, %c0_i32 : i32, i32
  }
  func.func @transform_1(%arg0: i32) -> i32 {
    %c0_i32 = arith.constant 0 : i32
    %c0_i32_0 = arith.constant 0 : i32
    return %c0_i32 : i32
  }
  func.func @transform_2(%arg0: i32) -> i32 {
    %c0_i32 = arith.constant 0 : i32
    %c0_i32_0 = arith.constant 0 : i32
    return %c0_i32 : i32
  }
  func.func @transform_3(%arg0: i32) -> i32 {
    %c0_i32 = arith.constant 0 : i32
    %c0_i32_0 = arith.constant 0 : i32
    return %c0_i32 : i32
  }
  func.func @transform_4(%arg0: i32) -> i32 {
    %c0_i32 = arith.constant 0 : i32
    %c0_i32_0 = arith.constant 0 : i32
    return %c0_i32 : i32
  }
  func.func @transform_5(%arg0: i32) -> (i32, i32) {
    %c0_i32 = arith.constant 0 : i32
    %c0_i32_0 = arith.constant 0 : i32
    return %arg0, %c0_i32 : i32, i32
  }
}

</mosaic_0001>

<bundles_post_ra>
// kernel: tpu_custom_call.1
= control target key start
LH: loop header
LB: loop body
LE: loop exit
PB: predicated region body
PF: predicated region fallthrough
CT: control target
= control target key end

     0   :  { %10 = vsyncpa [#allocation3], 0  ;;  %s528_s0 = inlined_call_operand.hbm [shape: f32[2,128], index: 0, kind: input, shape index: {}]   ;;  %s529_s1 = inlined_call_operand.vmem [shape: f32[10], index: 1, kind: input, shape index: {}]   ;;  %s530_s2 = inlined_call_operand.vmem [shape: f32[10], index: 2, kind: input, shape index: {}]   ;;  %s531_s3 = inlined_call_operand.vmem [shape: f32[10], index: 3, kind: input, shape index: {}]   ;;  %s532_s4 = inlined_call_operand.vmem [shape: f32[2], index: 4, kind: input, shape index: {}]   ;;  %s533_s5 = inlined_call_operand.hbm [shape: f32[2,128], index: 5, kind: output, shape index: {}]  }
   0x1   :  { %11 = vsyncpa [#allocation5], 0 }
   0x2   :  { %12 = vsyncpa [#allocation8], 0 }
   0x3   :  { %13 = vsyncpa [#allocation11], 0  ;;  %s41_s20 = sshll.u32 %s530_s2, 4  ;;  %s42_s20 = int_to_ptr.vmem [resolvable:$true] %s41_s20 }
   0x4   :  { %14 = vsyncpa [#allocation4], 0  ;;  %s281_s21 = scalar_lea.vmem %s42_s20, 16  ;;  %p286_p1 = scmp.lt.s32.totalorder %s42_s20, %s42_s20 }
   0x5   :  { %p282_p0 = scmp.ne.s32.totalorder %s42_s20, %s281_s21  ;;  %p287_p2 = scmp.lt.s32.totalorder %s281_s21, %s281_s21 }
   0x7   :  { %p288_p3 = por %p287_p2, %p286_p1 }
   0x9   :  { %p289_p4 = pnand %p288_p3, %p282_p0 }
   0xb   :  { %292 = shalt.err (!%p289_p4)
}
   0xc   :  { %s383_s22 = smov [#allocation7]   ;;  %s384_s23 = smov [#allocation2]  }
   0xd   :  { %44 = dma.vmem_to_smem %s42_s20, 16, %s383_s22, [#allocation8]  }
   0xe   :  { %s21_s24 = sshll.u32 %s384_s23, 4  ;;  %s31_s27 = sshll.u32 %s529_s1, 4  ;;  %s22_s24 = int_to_ptr.vmem [resolvable:$true] %s21_s24  ;;  %s32_s27 = int_to_ptr.vmem [resolvable:$true] %s31_s27 }
   0xf   :  { %s293_s29 = scalar_lea.hbm %s528_s0, 32 }
  0x10   :  { %p294_p5 = scmp.ne.s32.totalorder %s528_s0, %s293_s29  ;;  %p297_p6 = scmp.lt.u32.totalorder %s293_s29, %s528_s0 }
  0x12   :  { %p299_p7 = pnand %p297_p6, %p294_p5 }
  0x14   :  { %302 = shalt.err (!%p299_p7)
}
  0x15   :  { %s303_s9 = scalar_lea.vmem %s22_s24, 32  ;;  %p308_p9 = scmp.lt.s32.totalorder %s22_s24, %s22_s24 }
  0x16   :  { %p304_p8 = scmp.ne.s32.totalorder %s22_s24, %s303_s9  ;;  %p309_p10 = scmp.lt.s32.totalorder %s303_s9, %s303_s9 }
  0x18   :  { %p310_p11 = por %p309_p10, %p308_p9 }
  0x1a   :  { %p311_p12 = pnand %p310_p11, %p304_p8 }
  0x1c   :  { %314 = shalt.err (!%p311_p12)
}
  0x1d   :  { %24 = dma.hbm_to_vmem [thread:$0]  %s528_s0, 32, %s22_s24, [#allocation3]  }
  0x1e   :  { %s51_s13 = sshll.u32 %s531_s3, 4  ;;  %s315_s14 = scalar_lea.vmem %s32_s27, 16  ;;  %s52_s13 = int_to_ptr.vmem [resolvable:$true] %s51_s13 }
  0x1f   :  { %p316_p13 = scmp.ne.s32.totalorder %s32_s27, %s315_s14  ;;  %p320_p0 = scmp.lt.s32.totalorder %s32_s27, %s32_s27 }
  0x20   :  { %p321_p1 = scmp.lt.s32.totalorder %s315_s14, %s315_s14 }
  0x22   :  { %p322_p2 = por %p321_p1, %p320_p0 }
  0x24   :  { %p323_p3 = pnand %p322_p2, %p316_p13 }
  0x26   :  { %326 = shalt.err (!%p323_p3)
}
  0x27   :  { %s385_s15 = smov [#allocation6]   ;;  %s327_s16 = scalar_lea.vmem %s52_s13, 16 }
  0x28   :  { %34 = dma.vmem_to_smem %s32_s27, 16, %s385_s15, [#allocation5]  }
  0x29   :  { %p328_p4 = scmp.ne.s32.totalorder %s52_s13, %s327_s16  ;;  %p332_p5 = scmp.lt.s32.totalorder %s52_s13, %s52_s13 }
  0x2a   :  { %p333_p6 = scmp.lt.s32.totalorder %s327_s16, %s327_s16 }
  0x2c   :  { %p334_p7 = por %p333_p6, %p332_p5 }
  0x2e   :  { %p335_p8 = pnand %p334_p7, %p328_p4 }
  0x30   :  { %338 = shalt.err (!%p335_p8)
}
  0x31   :  { %s386_s0 = smov [#allocation9]   ;;  %s61_s18 = sshll.u32 %s532_s4, 4  ;;  %s62_s18 = int_to_ptr.vmem [resolvable:$true] %s61_s18 }
  0x32   :  { %54 = dma.vmem_to_smem %s52_s13, 16, %s386_s0, [#allocation8]  }
  0x33   :  { %s339_s19 = scalar_lea.vmem %s62_s18, 16  ;;  %p344_p10 = scmp.lt.s32.totalorder %s62_s18, %s62_s18 }
  0x34   :  { %p340_p9 = scmp.ne.s32.totalorder %s62_s18, %s339_s19  ;;  %p345_p11 = scmp.lt.s32.totalorder %s339_s19, %s339_s19 }
  0x36   :  { %p346_p12 = por %p345_p11, %p344_p10 }
  0x38   :  { %p347_p13 = pnand %p346_p12, %p340_p9 }
  0x3a   :  { %350 = shalt.err (!%p347_p13)
}
  0x3b   :  { %s387_s20 = smov [#allocation10]  }
  0x3c   :  { %64 = dma.vmem_to_smem %s62_s18, 16, %s387_s20, [#allocation11]  }
  0x3d   :  { %373 = dma.done.wait [#allocation3], 32  }
  0x3e   :  { %374 = vsyncadd [#allocation3], 4294967264 }
  0x3f   :  { %375 = dma.done.wait [#allocation5], 16  }
  0x40   :  { %376 = vsyncadd [#allocation5], 4294967280 }
  0x41   :  { %377 = dma.done.wait [#allocation8], 32  }
  0x42   :  { %378 = vsyncadd [#allocation8], 4294967264 }
  0x43   :  { %379 = dma.done.wait [#allocation11], 16  }
  0x44   :  { %380 = vsyncadd [#allocation11], 4294967280 }
  0x45   :  { %80 = sfence }
  0x46   :  { %s82_s4 = sld [smem:[#allocation6]]  ;;  %s227_s21 = sld [smem:[#allocation6 + $0x1]]  ;;  %v451_v0 = vld [vmem:[#allocation2] sm:$0x3] }
  0x47   :  { %s228_s22 = sld [smem:[#allocation6 + $0x2]]  ;;  %s229_s23 = sld [smem:[#allocation6 + $0x3]] }
  0x48   :  { %s230_s24 = sld [smem:[#allocation6 + $0x4]]  ;;  %s231_s25 = sld [smem:[#allocation6 + $0x5]] }
  0x49   :  { %s443_s26 = sld [smem:[#allocation6 + $0x6]]  ;;  %s445_s27 = sld [smem:[#allocation6 + $0x7]] }
  0x4a   :  { %s447_s2 = sld [smem:[#allocation6 + $0x8]]  ;;  %s449_s28 = sld [smem:[#allocation6 + $0x9]] }
  0x4b   :  { %s92_s29 = sld [smem:[#allocation7]]  ;;  %s236_s30 = sld [smem:[#allocation7 + $0x1]] }
  0x4c   :  { %s453_s6 = sld [smem:[#allocation7 + $0x2]]  ;;  %s238_s7 = sld [smem:[#allocation7 + $0x3]]  ;;  %v118_v1 = vstv %s82_s4  ;;  %v127_v2 = vstv %s227_s21 }
  0x4d   :  { %s455_s8 = sld [smem:[#allocation7 + $0x4]]  ;;  %s457_s9 = sld [smem:[#allocation7 + $0x5]]  ;;  %v136_v3 = vstv %s228_s22  ;;  %v145_v4 = vstv %s229_s23  ;;  %v119_v5 = vmul.f32 %v118_v1, %v451_v0  ;;  %v128_v6 = vmul.f32 %v127_v2, %v451_v0 }
  0x4e   :  { %s459_s1 = sld [smem:[#allocation7 + $0x6]]  ;;  %s461_s10 = sld [smem:[#allocation7 + $0x7]]  ;;  %v154_v7 = vstv %s230_s24  ;;  %v163_v8 = vstv %s231_s25  ;;  %v137_v9 = vmul.f32 %v136_v3, %v451_v0  ;;  %v146_v10 = vmul.f32 %v145_v4, %v451_v0 }
  0x4f   :  { %s465_s11 = sld [smem:[#allocation7 + $0x8]]  ;;  %v172_v11 = vstv %s443_s26  ;;  %v155_v12 = vmul.f32 %v154_v7, %v451_v0  ;;  %v164_v13 = vmul.f32 %v163_v8, %v451_v0  ;;  %v181_v14 = vstv %s445_s27  ;;  %s473_s12 = sld [smem:[#allocation7 + $0x9]] }
  0x50   :  { %v173_v17 = vmul.f32 %v172_v11, %v451_v0  ;;  %v190_v18 = vstv %s447_s2  ;;  %v182_v29 = vmul.f32 %v181_v14, %v451_v0  ;;  %s112_s13 = sld [smem:[#allocation10]]  ;;  %s482_s14 = sld [smem:[#allocation10 + $0x1]]  ;;  %v199_v32 = vstv %s449_s28 }
  0x51   :  { %v120_v15 = vstv %s92_s29  ;;  %v129_v16 = vstv %s236_s30  ;;  %s486_s15 = sld [smem:[#allocation9]]  ;;  %v191_v34 = vmul.f32 %v190_v18, %v451_v0  ;;  %s489_s16 = sld [smem:[#allocation9 + $0x1]]  ;;  %v200_v37 = vmul.f32 %v199_v32, %v451_v0 }
  0x52   :  { %v121_v19 = vadd.f32 %v120_v15, %v119_v5  ;;  %v130_v20 = vadd.f32 %v129_v16, %v128_v6  ;;  %v138_v21 = vstv %s453_s6  ;;  %v147_v22 = vstv %s238_s7  ;;  %s492_s0 = sld [smem:[#allocation9 + $0x2]]  ;;  %s496_s3 = sld [smem:[#allocation9 + $0x3]] }
  0x53   :  { %v139_v23 = vadd.f32 %v138_v21, %v137_v9  ;;  %v148_v24 = vadd.f32 %v147_v22, %v146_v10  ;;  %v156_v25 = vstv %s455_s8  ;;  %v165_v26 = vstv %s457_s9  ;;  %s498_s17 = sld [smem:[#allocation9 + $0x4]]  ;;  %s502_s18 = sld [smem:[#allocation9 + $0x5]] }
  0x54   :  { %261 = vtanh.f32 %v121_v19  ;;  %v157_v27 = vadd.f32 %v156_v25, %v155_v12  ;;  %v174_v28 = vstv %s459_s1  ;;  %v166_v30 = vadd.f32 %v165_v26, %v164_v13  ;;  %s506_s19 = sld [smem:[#allocation9 + $0x6]]  ;;  %s509_s20 = sld [smem:[#allocation9 + $0x7]] }
  0x55   :  { %263 = vtanh.f32 %v130_v20  ;;  %v183_v31 = vstv %s461_s10  ;;  %v175_v33 = vadd.f32 %v174_v28, %v173_v17  ;;  %v192_v35 = vstv %s465_s11  ;;  %s252_s4 = sld [smem:[#allocation9 + $0x8]]  ;;  %s253_s21 = sld [smem:[#allocation9 + $0x9]] }
  0x56   :  { %265 = vtanh.f32 %v139_v23  ;;  %v184_v36 = vadd.f32 %v183_v31, %v182_v29  ;;  %v201_v38 = vstv %s473_s12  ;;  %v193_v39 = vadd.f32 %v192_v35, %v191_v34  ;;  %s388_s22 = smov [#allocation12]  }
  0x57   :  { %267 = vtanh.f32 %v148_v24  ;;  %v114_v40 = vstv %s112_s13  ;;  %v116_v42 = vstv %s482_s14  ;;  %v202_v43 = vadd.f32 %v201_v38, %v200_v37  ;;  %s215_s23 = sshll.u32 %s388_s22, 4  ;;  %s216_s23 = int_to_ptr.vmem [resolvable:$true] %s215_s23 }
  0x58   :  { %269 = vtanh.f32 %v157_v27  ;;  %v115_v41 = vmul.f32 %v114_v40, %v451_v0  ;;  %v124_v45 = vstv %s486_s15  ;;  %v133_v49 = vstv %s489_s16  ;;  %s351_s24 = scalar_lea.vmem %s216_s23, 32  ;;  %p356_p1 = scmp.lt.s32.totalorder %s216_s23, %s216_s23 }
  0x59   :  { %271 = vtanh.f32 %v166_v30  ;;  %v142_v52 = vstv %s492_s0  ;;  %v151_v59 = vstv %s496_s3  ;;  %v160_v1 = vstv %s498_s17  ;;  %p352_p0 = scmp.ne.s32.totalorder %s216_s23, %s351_s24  ;;  %p357_p2 = scmp.lt.s32.totalorder %s351_s24, %s351_s24 }
  0x5a   :  { %273 = vtanh.f32 %v175_v33  ;;  %v117_v47 = vadd.f32 %v116_v42, %v115_v41  ;;  %v169_v6 = vstv %s502_s18  ;;  %v178_v11 = vstv %s506_s19 }
  0x5b   :  { %275 = vtanh.f32 %v184_v36  ;;  %v187_v16 = vstv %s509_s20  ;;  %p358_p3 = por %p357_p2, %p356_p1 }
  0x5c   :  { %277 = vtanh.f32 %v193_v39 }
  0x5d   :  { %279 = vtanh.f32 %v202_v43  ;;  %p359_p4 = pnand %p358_p3, %p352_p0 }
  0x5e   :  { %v262_v44 = vpop.eup %261 }
  0x5f   :  { %v264_v46 = vpop.eup %263  ;;  %v123_v48 = vmul.f32 %v262_v44, %v121_v19 }
  0x60   :  { %v266_v50 = vpop.eup %265  ;;  %v132_v51 = vmul.f32 %v264_v46, %v130_v20  ;;  %v196_v20 = vstv %s252_s4 }
  0x61   :  { %v268_v53 = vpop.eup %267  ;;  %v125_v54 = vmul.f32 %v124_v45, %v123_v48  ;;  %v141_v55 = vmul.f32 %v266_v50, %v139_v23 }
  0x62   :  { %v270_v56 = vpop.eup %269  ;;  %v134_v57 = vmul.f32 %v133_v49, %v132_v51  ;;  %v150_v58 = vmul.f32 %v268_v53, %v148_v24  ;;  %v205_v24 = vstv %s253_s21 }
  0x63   :  { %v272_v60 = vpop.eup %271  ;;  %v126_v61 = vadd.f32 %v125_v54, %v117_v47  ;;  %v143_v62 = vmul.f32 %v142_v52, %v141_v55  ;;  %v159_v63 = vmul.f32 %v270_v56, %v157_v27 }
  0x64   :  { %v274_v0 = vpop.eup %273  ;;  %v152_v3 = vmul.f32 %v151_v59, %v150_v58  ;;  %v168_v4 = vmul.f32 %v272_v60, %v166_v30 }
  0x65   :  { %v135_v2 = vadd.f32 %v134_v57, %v126_v61  ;;  %v276_v5 = vpop.eup %275  ;;  %v161_v8 = vmul.f32 %v160_v1, %v159_v63  ;;  %v177_v9 = vmul.f32 %v274_v0, %v175_v33 }
  0x66   :  { %v278_v10 = vpop.eup %277  ;;  %v170_v13 = vmul.f32 %v169_v6, %v168_v4  ;;  %v186_v14 = vmul.f32 %v276_v5, %v184_v36 }
  0x67   :  { %v144_v7 = vadd.f32 %v143_v62, %v135_v2  ;;  %v280_v15 = vpop.eup %279  ;;  %v179_v18 = vmul.f32 %v178_v11, %v177_v9  ;;  %v195_v19 = vmul.f32 %v278_v10, %v193_v39 }
  0x68   :  { %v188_v22 = vmul.f32 %v187_v16, %v186_v14  ;;  %v204_v23 = vmul.f32 %v280_v15, %v202_v43 }
  0x69   :  { %v153_v12 = vadd.f32 %v152_v3, %v144_v7  ;;  %v197_v26 = vmul.f32 %v196_v20, %v195_v19 }
  0x6a   :  { %v206_v28 = vmul.f32 %v205_v24, %v204_v23 }
  0x6b   :  { %v162_v17 = vadd.f32 %v161_v8, %v153_v12 }
  0x6d   :  { %v171_v21 = vadd.f32 %v170_v13, %v162_v17 }
  0x6f   :  { %v180_v25 = vadd.f32 %v179_v18, %v171_v21 }
  0x71   :  { %v189_v27 = vadd.f32 %v188_v22, %v180_v25 }
  0x73   :  { %v198_v29 = vadd.f32 %v197_v26, %v189_v27 }
  0x75   :  { %v207_v30 = vadd.f32 %v206_v28, %v198_v29 }
  0x77   :  { %208 = vst [vmem:[#allocation12] sm:$0x3] %v207_v30 }
  0x78   :  { %362 = shalt.err (!%p359_p4)
}
  0x79   :  { %s363_s27 = scalar_lea.hbm %s533_s5, 32 }
  0x7a   :  { %p364_p5 = scmp.ne.s32.totalorder %s533_s5, %s363_s27  ;;  %p367_p6 = scmp.lt.u32.totalorder %s363_s27, %s533_s5 }
  0x7c   :  { %p369_p7 = pnand %p367_p6, %p364_p5 }
  0x7e   :  { %372 = shalt.err (!%p369_p7)
}
  0x7f   :  { %218 = dma.vmem_to_hbm [thread:$0]  %s216_s23, 32, %s533_s5, [#allocation4]  }
  0x80   :  { %381 = dma.done.wait [#allocation4], 32  }
  0x81   :  { %382 = vsyncadd [#allocation4], 4294967264 }
  0x82   :  { %222 = vsyncpa [#allocation3], 1 }
  0x83   :  { %223 = vsyncpa [#allocation4], 1 }
  0x84   :  { %224 = vsyncpa [#allocation5], 1 }
  0x85   :  { %225 = vsyncpa [#allocation8], 1 }
  0x86   :  { %226 = vsyncpa [#allocation11], 1 }

</bundles_post_ra>
